<compile_context>
chip_gen: v7x
topology: tpu7x:2x2x1
jax: 0.10.0
libtpu: 0.0.40
codegen_flags: <defaults>
</compile_context>

<pallas_src>
import functools

import jax
import jax.numpy as jnp
from jax.experimental import pallas as pl
from jax.experimental.pallas import tpu as pltpu


def _dwconv_bn_kernel(x_ref, wm_ref, shift_ref, o_ref, *, K, W, HW, pad):
    # x_ref:     (NBC, HW)       NB images; row = (image, channel), lane = h*W + w
    # wm_ref:    (K*K, NBC, HW)  per-tap filter weight (BN scale folded in) *
    #                            spatial-boundary mask (0 where the tap would
    #                            have read padding / rolled around the image)
    # shift_ref: (NBC, HW)       folded BN shift ((bias-mean)*scale + beta)
    # o_ref:     (NBC, HW)
    x = x_ref[...].astype(jnp.float32)
    acc = shift_ref[...]                        # accumulator starts at the BN shift
    for ki in range(K):
        for kj in range(K):
            d = (ki - pad) * W + (kj - pad)     # static lane offset of this tap
            xs = x if d == 0 else pltpu.roll(x, shift=(-d) % HW, axis=1)
            acc = acc + xs * wm_ref[ki * K + kj]
    o_ref[...] = acc.astype(o_ref.dtype)


def _images_per_step(B, C):
    """Images per grid step: whole batch on single-TC chips (v5e/v6e); one
    image per TensorCore on v7x (2 TCs/chip)."""
    kind = jax.devices()[0].device_kind.lower()
    two_tensorcores = "7" in kind               # v7x family
    if two_tensorcores and B % 2 == 0 and ((B // 2) * C) % 8 == 0:
        return B // 2
    return B


def depthwise_conv_bn(x, weight, conv_bias, bn_gamma, bn_beta, bn_mean, bn_var,
                      *, eps=1e-5):
    """x: (B, C, H, W).  weight: (C, 1, K, K).  Depthwise conv (groups=C,
    stride=1, padding=K//2, bias) + BatchNorm2d (inference mode)."""
    B, C, H, W = x.shape
    K = weight.shape[-1]
    pad = K // 2
    HW = H * W

    NB = _images_per_step(B, C)     # images per grid step
    n_steps = B // NB
    NBC = NB * C

    # --- fold BatchNorm into the conv (tiny, stays in plain JAX) -------------
    scale = (bn_gamma / jnp.sqrt(bn_var + eps)).astype(jnp.float32)        # (C,)
    shift_c = ((conv_bias - bn_mean) * scale + bn_beta).astype(jnp.float32)  # (C,)
    w_folded = weight.reshape(C, K, K).astype(jnp.float32) * scale[:, None, None]

    # Per-tap weight plane over the (channel, h*W+w) grid, with the spatial
    # boundary mask (where the tap would read the zero pad) folded in as zeros.
    hs = jnp.arange(H)
    ws = jnp.arange(W)
    wm_taps = []
    for ki in range(K):
        for kj in range(K):
            vh = (hs + (ki - pad) >= 0) & (hs + (ki - pad) < H)     # (H,)
            vw = (ws + (kj - pad) >= 0) & (ws + (kj - pad) < W)     # (W,)
            m = (vh[:, None] & vw[None, :]).reshape(HW).astype(jnp.float32)
            wm_taps.append(w_folded[:, ki, kj][:, None] * m[None, :])   # (C, HW)
    wm = jnp.tile(jnp.stack(wm_taps, axis=0), (1, NB, 1))   # (K*K, NB*C, HW)
    shift_t = jnp.tile(shift_c[:, None], (NB, HW))          # (NB*C, HW)

    kernel = functools.partial(_dwconv_bn_kernel, K=K, W=W, HW=HW, pad=pad)

    # (B, C, H, W) -> (B*C, H*W) is a pure metadata reshape (no HBM copy).
    out_flat = pl.pallas_call(
        kernel,
        out_shape=jax.ShapeDtypeStruct((B * C, HW), x.dtype),
        grid_spec=pltpu.PrefetchScalarGridSpec(
            num_scalar_prefetch=0,
            grid=(n_steps,),
            in_specs=[
                pl.BlockSpec((NBC, HW), lambda b: (b, 0)),
                pl.BlockSpec((K * K, NBC, HW), lambda b: (0, 0, 0)),  # loaded once
                pl.BlockSpec((NBC, HW), lambda b: (0, 0)),            # loaded once
            ],
            out_specs=pl.BlockSpec((NBC, HW), lambda b: (b, 0)),
        ),
        compiler_params=pltpu.CompilerParams(
            dimension_semantics=("parallel",)),
    )(x.reshape(B * C, HW), wm, shift_t)

    return out_flat.reshape(B, C, H, W)


def _reference(x, weight, conv_bias, bn_gamma, bn_beta, bn_mean, bn_var, eps=1e-5):
    C = x.shape[1]
    y = jax.lax.conv_general_dilated(
        x, weight, window_strides=(1, 1), padding="SAME",
        dimension_numbers=("NCHW", "OIHW", "NCHW"),
        feature_group_count=C)
    y = y + conv_bias.reshape(1, C, 1, 1)
    scale = bn_gamma / jnp.sqrt(bn_var + eps)
    return (y - bn_mean.reshape(1, C, 1, 1)) * scale.reshape(1, C, 1, 1) \
        + bn_beta.reshape(1, C, 1, 1)


if __name__ == "__main__":
    key = jax.random.PRNGKey(0)
    kx, kw, kb, kg, kbe, km, kv = jax.random.split(key, 7)

    B, C, H, W, K = 2, 8, 16, 16, 3   # in_channels = out_channels = C, groups = C

    x = jax.random.normal(kx, (B, C, H, W), jnp.float32)
    weight = jax.random.normal(kw, (C, 1, K, K), jnp.float32) * 0.2
    conv_bias = jax.random.normal(kb, (C,), jnp.float32) * 0.1
    bn_gamma = 1.0 + 0.1 * jax.random.normal(kg, (C,), jnp.float32)
    bn_beta = 0.1 * jax.random.normal(kbe, (C,), jnp.float32)
    bn_mean = 0.1 * jax.random.normal(km, (C,), jnp.float32)
    bn_var = jnp.abs(jax.random.normal(kv, (C,), jnp.float32)) + 0.5

    out = depthwise_conv_bn(x, weight, conv_bias, bn_gamma, bn_beta, bn_mean, bn_var)
    out = jax.block_until_ready(out)

    ref = _reference(x, weight, conv_bias, bn_gamma, bn_beta, bn_mean, bn_var)
    assert out.shape == (B, C, H, W)
    assert jnp.allclose(out, ref, atol=1e-4, rtol=1e-4), "mismatch vs reference"

    print("KERNEL_OK")
</pallas_src>

<mosaic_0001>
module attributes {stable_mosaic.version = 11 : i64} {
  func.func @_dwconv_bn_kernel(%arg0: i32, %arg1: memref<16x256xf32, #tpu.memory_space<vmem>>, %arg2: memref<9x16x256xf32, #tpu.memory_space<vmem>>, %arg3: memref<16x256xf32, #tpu.memory_space<vmem>>, %arg4: memref<16x256xf32, #tpu.memory_space<vmem>>) attributes {dimension_semantics = [#tpu.dimension_semantics<parallel>], iteration_bounds = array<i64: 1>, scalar_prefetch = 0 : i64, scratch_operands = 0 : i64, tpu.core_type = #tpu.core_type<tc>, window_params = [{transform_indices = @transform_0, window_bounds = array<i64: 16, 256>}, {pipeline_mode = #tpu.pipeline_mode<synchronous>, transform_indices = @transform_1, window_bounds = array<i64: 9, 16, 256>}, {pipeline_mode = #tpu.pipeline_mode<synchronous>, transform_indices = @transform_2, window_bounds = array<i64: 16, 256>}, {transform_indices = @transform_3, window_bounds = array<i64: 16, 256>}]} {
    %c0 = arith.constant 0 : index
    %c0_0 = arith.constant 0 : index
    %0 = vector.load %arg1[%c0, %c0_0] : memref<16x256xf32, #tpu.memory_space<vmem>>, vector<16x256xf32>
    %c0_1 = arith.constant 0 : index
    %c0_2 = arith.constant 0 : index
    %1 = vector.load %arg3[%c0_1, %c0_2] : memref<16x256xf32, #tpu.memory_space<vmem>>, vector<16x256xf32>
    %c17_i32 = arith.constant 17 : i32
    %2 = tpu.dynamic_rotate %0 by %c17_i32 dim 1 : vector<16x256xf32>, i32 -> vector<16x256xf32>
    %c0_3 = arith.constant 0 : index
    %c0_4 = arith.constant 0 : index
    %c0_5 = arith.constant 0 : index
    %3 = vector.load %arg2[%c0_3, %c0_4, %c0_5] : memref<9x16x256xf32, #tpu.memory_space<vmem>>, vector<1x16x256xf32>
    %4 = vector.shape_cast %3 : vector<1x16x256xf32> to vector<16x256xf32>
    %5 = arith.mulf %2, %4 : vector<16x256xf32>
    %6 = arith.addf %1, %5 : vector<16x256xf32>
    %c16_i32 = arith.constant 16 : i32
    %7 = tpu.dynamic_rotate %0 by %c16_i32 dim 1 : vector<16x256xf32>, i32 -> vector<16x256xf32>
    %c1 = arith.constant 1 : index
    %c0_6 = arith.constant 0 : index
    %c0_7 = arith.constant 0 : index
    %8 = vector.load %arg2[%c1, %c0_6, %c0_7] : memref<9x16x256xf32, #tpu.memory_space<vmem>>, vector<1x16x256xf32>
    %9 = vector.shape_cast %8 : vector<1x16x256xf32> to vector<16x256xf32>
    %10 = arith.mulf %7, %9 : vector<16x256xf32>
    %11 = arith.addf %6, %10 : vector<16x256xf32>
    %c15_i32 = arith.constant 15 : i32
    %12 = tpu.dynamic_rotate %0 by %c15_i32 dim 1 : vector<16x256xf32>, i32 -> vector<16x256xf32>
    %c2 = arith.constant 2 : index
    %c0_8 = arith.constant 0 : index
    %c0_9 = arith.constant 0 : index
    %13 = vector.load %arg2[%c2, %c0_8, %c0_9] : memref<9x16x256xf32, #tpu.memory_space<vmem>>, vector<1x16x256xf32>
    %14 = vector.shape_cast %13 : vector<1x16x256xf32> to vector<16x256xf32>
    %15 = arith.mulf %12, %14 : vector<16x256xf32>
    %16 = arith.addf %11, %15 : vector<16x256xf32>
    %c1_i32 = arith.constant 1 : i32
    %17 = tpu.dynamic_rotate %0 by %c1_i32 dim 1 : vector<16x256xf32>, i32 -> vector<16x256xf32>
    %c3 = arith.constant 3 : index
    %c0_10 = arith.constant 0 : index
    %c0_11 = arith.constant 0 : index
    %18 = vector.load %arg2[%c3, %c0_10, %c0_11] : memref<9x16x256xf32, #tpu.memory_space<vmem>>, vector<1x16x256xf32>
    %19 = vector.shape_cast %18 : vector<1x16x256xf32> to vector<16x256xf32>
    %20 = arith.mulf %17, %19 : vector<16x256xf32>
    %21 = arith.addf %16, %20 : vector<16x256xf32>
    %c4 = arith.constant 4 : index
    %c0_12 = arith.constant 0 : index
    %c0_13 = arith.constant 0 : index
    %22 = vector.load %arg2[%c4, %c0_12, %c0_13] : memref<9x16x256xf32, #tpu.memory_space<vmem>>, vector<1x16x256xf32>
    %23 = vector.shape_cast %22 : vector<1x16x256xf32> to vector<16x256xf32>
    %24 = arith.mulf %0, %23 : vector<16x256xf32>
    %25 = arith.addf %21, %24 : vector<16x256xf32>
    %c255_i32 = arith.constant 255 : i32
    %26 = tpu.dynamic_rotate %0 by %c255_i32 dim 1 : vector<16x256xf32>, i32 -> vector<16x256xf32>
    %c5 = arith.constant 5 : index
    %c0_14 = arith.constant 0 : index
    %c0_15 = arith.constant 0 : index
    %27 = vector.load %arg2[%c5, %c0_14, %c0_15] : memref<9x16x256xf32, #tpu.memory_space<vmem>>, vector<1x16x256xf32>
    %28 = vector.shape_cast %27 : vector<1x16x256xf32> to vector<16x256xf32>
    %29 = arith.mulf %26, %28 : vector<16x256xf32>
    %30 = arith.addf %25, %29 : vector<16x256xf32>
    %c241_i32 = arith.constant 241 : i32
    %31 = tpu.dynamic_rotate %0 by %c241_i32 dim 1 : vector<16x256xf32>, i32 -> vector<16x256xf32>
    %c6 = arith.constant 6 : index
    %c0_16 = arith.constant 0 : index
    %c0_17 = arith.constant 0 : index
    %32 = vector.load %arg2[%c6, %c0_16, %c0_17] : memref<9x16x256xf32, #tpu.memory_space<vmem>>, vector<1x16x256xf32>
    %33 = vector.shape_cast %32 : vector<1x16x256xf32> to vector<16x256xf32>
    %34 = arith.mulf %31, %33 : vector<16x256xf32>
    %35 = arith.addf %30, %34 : vector<16x256xf32>
    %c240_i32 = arith.constant 240 : i32
    %36 = tpu.dynamic_rotate %0 by %c240_i32 dim 1 : vector<16x256xf32>, i32 -> vector<16x256xf32>
    %c7 = arith.constant 7 : index
    %c0_18 = arith.constant 0 : index
    %c0_19 = arith.constant 0 : index
    %37 = vector.load %arg2[%c7, %c0_18, %c0_19] : memref<9x16x256xf32, #tpu.memory_space<vmem>>, vector<1x16x256xf32>
    %38 = vector.shape_cast %37 : vector<1x16x256xf32> to vector<16x256xf32>
    %39 = arith.mulf %36, %38 : vector<16x256xf32>
    %40 = arith.addf %35, %39 : vector<16x256xf32>
    %c239_i32 = arith.constant 239 : i32
    %41 = tpu.dynamic_rotate %0 by %c239_i32 dim 1 : vector<16x256xf32>, i32 -> vector<16x256xf32>
    %c8 = arith.constant 8 : index
    %c0_20 = arith.constant 0 : index
    %c0_21 = arith.constant 0 : index
    %42 = vector.load %arg2[%c8, %c0_20, %c0_21] : memref<9x16x256xf32, #tpu.memory_space<vmem>>, vector<1x16x256xf32>
    %43 = vector.shape_cast %42 : vector<1x16x256xf32> to vector<16x256xf32>
    %44 = arith.mulf %41, %43 : vector<16x256xf32>
    %45 = arith.addf %40, %44 : vector<16x256xf32>
    %c0_22 = arith.constant 0 : index
    %c0_23 = arith.constant 0 : index
    %46 = vector.load %arg4[%c0_22, %c0_23] : memref<16x256xf32, #tpu.memory_space<vmem>>, vector<16x256xf32>
    tpu.vector_store %arg4[%c0_22, %c0_23], %45 {strides = array<i32>} : memref<16x256xf32, #tpu.memory_space<vmem>>, vector<16x256xf32>,
    return
  }
  func.func @transform_0(%arg0: i32) -> (i32, i32) {
    %c0_i32 = arith.constant 0 : i32
    %c0_i32_0 = arith.constant 0 : i32
    return %arg0, %c0_i32 : i32, i32
  }
  func.func @transform_1(%arg0: i32) -> (i32, i32, i32) {
    %c0_i32 = arith.constant 0 : i32
    %c0_i32_0 = arith.constant 0 : i32
    %c0_i32_1 = arith.constant 0 : i32
    %c0_i32_2 = arith.constant 0 : i32
    return %c0_i32, %c0_i32_0, %c0_i32_1 : i32, i32, i32
  }
  func.func @transform_2(%arg0: i32) -> (i32, i32) {
    %c0_i32 = arith.constant 0 : i32
    %c0_i32_0 = arith.constant 0 : i32
    %c0_i32_1 = arith.constant 0 : i32
    return %c0_i32, %c0_i32_0 : i32, i32
  }
  func.func @transform_3(%arg0: i32) -> (i32, i32) {
    %c0_i32 = arith.constant 0 : i32
    %c0_i32_0 = arith.constant 0 : i32
    return %arg0, %c0_i32 : i32, i32
  }
}

</mosaic_0001>

<bundles_post_ra>
// kernel: tpu_custom_call.1
= control target key start
LH: loop header
LB: loop body
LE: loop exit
PB: predicated region body
PF: predicated region fallthrough
CT: control target
= control target key end

     0   :  { %8 = vsyncpa [#allocation3], 0  ;;  %s652_s0 = inlined_call_operand.hbm [shape: f32[16,256], index: 0, kind: input, shape index: {}]   ;;  %s653_s1 = inlined_call_operand.hbm [shape: f32[9,16,256], index: 1, kind: input, shape index: {}]   ;;  %s654_s2 = inlined_call_operand.hbm [shape: f32[16,256], index: 2, kind: input, shape index: {}]   ;;  %s655_s3 = inlined_call_operand.hbm [shape: f32[16,256], index: 3, kind: output, shape index: {}]  }
   0x1   :  { %9 = vsyncpa [#allocation6], 0 }
   0x2   :  { %10 = vsyncpa [#allocation4], 0  ;;  %s415_s12 = smov [#allocation5]   ;;  %s416_s14 = smov [#allocation2]  }
   0x3   :  { %s28_s13 = sshll.u32 %s415_s12, 4  ;;  %s16_s15 = sshll.u32 %s416_s14, 4  ;;  %s29_s13 = int_to_ptr.vmem [resolvable:$true] %s28_s13  ;;  %s448_s15 = int_to_ptr.vmem [resolvable:$true] %s16_s15 }
   0x4   :  { %s321_s18 = scalar_lea.hbm %s653_s1, 4608 }
   0x5   :  { %p322_p0 = scmp.ne.s32.totalorder %s653_s1, %s321_s18  ;;  %p325_p1 = scmp.lt.u32.totalorder %s321_s18, %s653_s1 }
   0x7   :  { %p327_p2 = pnand %p325_p1, %p322_p0 }
   0x9   :  { %330 = shalt.err (!%p327_p2)
}
   0xa   :  { %s331_s23 = scalar_lea.vmem %s29_s13, 4608  ;;  %p336_p4 = scmp.lt.s32.totalorder %s29_s13, %s29_s13 }
   0xb   :  { %p332_p3 = scmp.ne.s32.totalorder %s29_s13, %s331_s23  ;;  %p337_p5 = scmp.lt.s32.totalorder %s331_s23, %s331_s23 }
   0xd   :  { %p338_p6 = por %p337_p5, %p336_p4 }
   0xf   :  { %p339_p7 = pnand %p338_p6, %p332_p3 }
  0x11   :  { %342 = shalt.err (!%p339_p7)
}
  0x12   :  { %s417_s24 = smov 256   ;;  %s418_s25 = smov 16  }
  0x13   :  { %34 = dma.hbm_to_vmem [thread:$0]  %s653_s1, 4608, %s29_s13, [#allocation6], %s417_s24, %s417_s24, %s418_s25  }
  0x14   :  { %s343_s30 = scalar_lea.hbm %s652_s0, 512 }
  0x15   :  { %p344_p8 = scmp.ne.s32.totalorder %s652_s0, %s343_s30  ;;  %p347_p9 = scmp.lt.u32.totalorder %s343_s30, %s652_s0 }
  0x17   :  { %p349_p10 = pnand %p347_p9, %p344_p8 }
  0x19   :  { %352 = shalt.err (!%p349_p10)
}
  0x1a   :  { %s353_s8 = scalar_lea.vmem %s448_s15, 512  ;;  %p358_p12 = scmp.lt.s32.totalorder %s448_s15, %s448_s15 }
  0x1b   :  { %p354_p11 = scmp.ne.s32.totalorder %s448_s15, %s353_s8  ;;  %p359_p13 = scmp.lt.s32.totalorder %s353_s8, %s353_s8 }
  0x1d   :  { %p360_p0 = por %p359_p13, %p358_p12 }
  0x1f   :  { %p361_p1 = pnand %p360_p0, %p354_p11 }
  0x21   :  { %364 = shalt.err (!%p361_p1)
}
  0x22   :  { %22 = dma.hbm_to_vmem [thread:$0]  %s652_s0, 512, %s448_s15, [#allocation3], %s417_s24, %s417_s24, %s418_s25  }
  0x23   :  { %s419_s10 = smov [#allocation7]   ;;  %s365_s14 = scalar_lea.hbm %s654_s2, 512 }
  0x24   :  { %s40_s11 = sshll.u32 %s419_s10, 4  ;;  %p366_p2 = scmp.ne.s32.totalorder %s654_s2, %s365_s14  ;;  %s41_s11 = int_to_ptr.vmem [resolvable:$true] %s40_s11 }
  0x25   :  { %p369_p3 = scmp.lt.u32.totalorder %s365_s14, %s654_s2 }
  0x27   :  { %p371_p4 = pnand %p369_p3, %p366_p2 }
  0x29   :  { %374 = shalt.err (!%p371_p4)
}
  0x2a   :  { %s375_s20 = scalar_lea.vmem %s41_s11, 512  ;;  %p380_p6 = scmp.lt.s32.totalorder %s41_s11, %s41_s11 }
  0x2b   :  { %p376_p5 = scmp.ne.s32.totalorder %s41_s11, %s375_s20  ;;  %p381_p7 = scmp.lt.s32.totalorder %s375_s20, %s375_s20 }
  0x2d   :  { %p382_p8 = por %p381_p7, %p380_p6 }
  0x2f   :  { %p383_p9 = pnand %p382_p8, %p376_p5 }
  0x31   :  { %386 = shalt.err (!%p383_p9)
}
  0x32   :  { %46 = dma.hbm_to_vmem [thread:$0]  %s654_s2, 512, %s41_s11, [#allocation6], %s417_s24, %s417_s24, %s418_s25  }
  0x33   :  { %409 = dma.done.wait [#allocation3], 512  }
  0x34   :  { %410 = vsyncadd [#allocation3], 4294966784 }
  0x35   :  { %411 = dma.done.wait [#allocation6], 5120  }
  0x36   :  { %412 = vsyncadd [#allocation6], 4294962176  ;;  %v500_v0 = vld [vmem:[#allocation2 + $0x8] sm:$0xff]  ;;  %v502_v1 = vld [vmem:[#allocation2] sm:$0xff]  ;;  %s420_s21 = smov 17   ;;  %s421_s2 = smov 15   ;;  %v72_v16 = vlaneseq }
  0x37   :  { %68 = vrot.lane.b32.xlu1 %v500_v0, %s420_s21  ;;  %64 = vrot.lane.b32.xlu0 %v502_v1, %s420_s21  ;;  %v506_v2 = vld [vmem:[#allocation2 + $0x18] sm:$0xff]  ;;  %v508_v3 = vld [vmem:[#allocation2 + $0x10] sm:$0xff]  ;;  %s422_s22 = smov 1   ;;  %s423_s23 = smov 127   ;;  %v79_v22 = vld [vmem:[#allocation5] sm:$0xff] }
  0x38   :  { %s424_s26 = smov 113   ;;  %s425_s27 = smov 112   ;;  %v546_v19 = vand.u32 127, %v72_v16  ;;  %v80_v25 = vld [vmem:[#allocation5 + $0x8] sm:$0xff]  ;;  %v81_v28 = vld [vmem:[#allocation5 + $0x10] sm:$0xff]  ;;  %v82_v29 = vld [vmem:[#allocation5 + $0x18] sm:$0xff] }
  0x39   :  { %s426_s28 = smov 111   ;;  %v107_v32 = vld [vmem:[#allocation5 + $0x30] sm:$0xff]  ;;  %v108_v34 = vld [vmem:[#allocation5 + $0x38] sm:$0xff]  ;;  %v105_v37 = vld [vmem:[#allocation5 + $0x20] sm:$0xff]  ;;  %s427_s29 = smov [#allocation8]  }
  0x3a   :  { %vm74_vm0 = vcmp.lt.s32.totalorder %v546_v19, 17  ;;  %vm99_vm1 = vcmp.lt.s32.totalorder %v546_v19, 16  ;;  %vm125_vm2 = vcmp.lt.s32.totalorder %v546_v19, 15  ;;  %v172_v33 = vld [vmem:[#allocation5 + $0x90] sm:$0xff]  ;;  %v106_v38 = vld [vmem:[#allocation5 + $0x28] sm:$0xff]  ;;  %v60_v41 = vld [vmem:[#allocation7] sm:$0xff] }
  0x3b   :  { %70 = vrot.lane.b32.xlu1 %v506_v2, %s420_s21  ;;  %66 = vrot.lane.b32.xlu0 %v508_v3, %s420_s21  ;;  %v61_v48 = vld [vmem:[#allocation7 + $0x8] sm:$0xff]  ;;  %v62_v49 = vld [vmem:[#allocation7 + $0x10] sm:$0xff]  ;;  %v63_v50 = vld [vmem:[#allocation7 + $0x18] sm:$0xff]  ;;  %vm151_vm3 = vcmp.lt.s32.totalorder %v546_v19, 1  ;;  %v569_v51 = vmul.f32 %v172_v33, %v508_v3  ;;  %vm190_vm4 = vcmp.lt.s32.totalorder %v546_v19, 127  ;;  %vm216_vm5 = vcmp.lt.s32.totalorder %v546_v19, 113 }
  0x3c   :  { %v133_v56 = vld [vmem:[#allocation5 + $0x50] sm:$0xff]  ;;  %v134_v57 = vld [vmem:[#allocation5 + $0x58] sm:$0xff]  ;;  %v131_v60 = vld [vmem:[#allocation5 + $0x40] sm:$0xff]  ;;  %vm242_vm6 = vcmp.lt.s32.totalorder %v546_v19, 112  ;;  %vm268_vm7 = vcmp.lt.s32.totalorder %v546_v19, 111  ;;  %s295_s30 = sshll.u32 %s427_s29, 4  ;;  %s296_s30 = int_to_ptr.vmem [resolvable:$true] %s295_s30 }
  0x3d   :  { %v132_v61 = vld [vmem:[#allocation5 + $0x48] sm:$0xff]  ;;  %s387_s4 = scalar_lea.vmem %s296_s30, 512  ;;  %p392_p11 = scmp.lt.s32.totalorder %s296_s30, %s296_s30 }
  0x3e   :  { %v158_v16 = vld [vmem:[#allocation5 + $0x68] sm:$0xff]  ;;  %p388_p10 = scmp.ne.s32.totalorder %s296_s30, %s387_s4  ;;  %p393_p12 = scmp.lt.s32.totalorder %s387_s4, %s387_s4 }
  0x3f   :  { %93 = vrot.lane.b32.xlu1 %v508_v3, %s418_s25  ;;  %91 = vrot.lane.b32.xlu0 %v502_v1, %s418_s25 }
  0x40   :  { %p394_p13 = por %p393_p12, %p392_p11 }
  0x42   :  { %p395_p0 = pnand %p394_p13, %p388_p10 }
  0x43   :  { %97 = vrot.lane.b32.xlu1 %v506_v2, %s418_s25  ;;  %95 = vrot.lane.b32.xlu0 %v500_v0, %s418_s25 }
  0x47   :  { %119 = vrot.lane.b32.xlu1 %v508_v3, %s421_s2  ;;  %117 = vrot.lane.b32.xlu0 %v502_v1, %s421_s2 }
  0x4b   :  { %123 = vrot.lane.b32.xlu1 %v506_v2, %s421_s2  ;;  %121 = vrot.lane.b32.xlu0 %v500_v0, %s421_s2 }
  0x4f   :  { %145 = vrot.lane.b32.xlu1 %v508_v3, %s422_s22  ;;  %143 = vrot.lane.b32.xlu0 %v502_v1, %s422_s22 }
  0x53   :  { %149 = vrot.lane.b32.xlu1 %v506_v2, %s422_s22  ;;  %147 = vrot.lane.b32.xlu0 %v500_v0, %s422_s22 }
  0x57   :  { %184 = vrot.lane.b32.xlu1 %v508_v3, %s423_s23  ;;  %182 = vrot.lane.b32.xlu0 %v502_v1, %s423_s23 }
  0x5b   :  { %188 = vrot.lane.b32.xlu1 %v506_v2, %s423_s23  ;;  %186 = vrot.lane.b32.xlu0 %v500_v0, %s423_s23 }
  0x5f   :  { %210 = vrot.lane.b32.xlu1 %v508_v3, %s424_s26  ;;  %208 = vrot.lane.b32.xlu0 %v502_v1, %s424_s26 }
  0x63   :  { %214 = vrot.lane.b32.xlu1 %v506_v2, %s424_s26  ;;  %212 = vrot.lane.b32.xlu0 %v500_v0, %s424_s26 }
  0x67   :  { %236 = vrot.lane.b32.xlu1 %v508_v3, %s425_s27  ;;  %234 = vrot.lane.b32.xlu0 %v502_v1, %s425_s27 }
  0x6b   :  { %240 = vrot.lane.b32.xlu1 %v506_v2, %s425_s27  ;;  %238 = vrot.lane.b32.xlu0 %v500_v0, %s425_s27 }
  0x6f   :  { %262 = vrot.lane.b32.xlu1 %v508_v3, %s426_s28  ;;  %260 = vrot.lane.b32.xlu0 %v502_v1, %s426_s28 }
  0x73   :  { %266 = vrot.lane.b32.xlu1 %v506_v2, %s426_s28  ;;  %264 = vrot.lane.b32.xlu0 %v500_v0, %s426_s28 }
  0xa9   :  { %v69_v4 = vpop.permute.xlu1 %68  ;;  %v65_v5 = vpop.permute.xlu0 %64 }
  0xaa   :  { %v75_v26 = vsel %vm74_vm0, %v65_v5, %v69_v4  ;;  %v77_v27 = vsel %vm74_vm0, %v69_v4, %v65_v5 }
  0xab   :  { %v83_v42 = vmul.f32 %v79_v22, %v77_v27  ;;  %v84_v43 = vmul.f32 %v80_v25, %v75_v26 }
  0xad   :  { %v71_v6 = vpop.permute.xlu1 %70  ;;  %v67_v7 = vpop.permute.xlu0 %66  ;;  %v87_v3 = vadd.f32 %v83_v42, %v60_v41  ;;  %v88_v4 = vadd.f32 %v84_v43, %v61_v48 }
  0xae   :  { %v76_v30 = vsel %vm74_vm0, %v67_v7, %v71_v6  ;;  %v78_v31 = vsel %vm74_vm0, %v71_v6, %v67_v7  ;;  %v159_v7 = vld [vmem:[#allocation5 + $0x70] sm:$0xff] }
  0xaf   :  { %v85_v44 = vmul.f32 %v81_v28, %v78_v31  ;;  %v86_v45 = vmul.f32 %v82_v29, %v76_v30  ;;  %v173_v28 = vld [vmem:[#allocation5 + $0x98] sm:$0xff]  ;;  %v170_v29 = vld [vmem:[#allocation5 + $0x80] sm:$0xff]  ;;  %v171_v30 = vld [vmem:[#allocation5 + $0x88] sm:$0xff] }
  0xb1   :  { %v94_v8 = vpop.permute.xlu1 %93  ;;  %v92_v9 = vpop.permute.xlu0 %91  ;;  %v89_v5 = vadd.f32 %v85_v44, %v62_v49  ;;  %v90_v6 = vadd.f32 %v86_v45, %v63_v50  ;;  %v198_v44 = vld [vmem:[#allocation5 + $0xb0] sm:$0xff]  ;;  %v199_v45 = vld [vmem:[#allocation5 + $0xb8] sm:$0xff] }
  0xb5   :  { %v98_v10 = vpop.permute.xlu1 %97  ;;  %v96_v11 = vpop.permute.xlu0 %95 }
  0xb6   :  { %v101_v35 = vsel %vm99_vm1, %v94_v8, %v98_v10  ;;  %v103_v36 = vsel %vm99_vm1, %v98_v10, %v94_v8  ;;  %v100_v39 = vsel %vm99_vm1, %v92_v9, %v96_v11  ;;  %v102_v40 = vsel %vm99_vm1, %v96_v11, %v92_v9  ;;  %v160_v10 = vld [vmem:[#allocation5 + $0x78] sm:$0xff] }
  0xb7   :  { %v111_v52 = vmul.f32 %v107_v32, %v103_v36  ;;  %v112_v53 = vmul.f32 %v108_v34, %v101_v35  ;;  %v109_v54 = vmul.f32 %v105_v37, %v102_v40  ;;  %v110_v55 = vmul.f32 %v106_v38, %v100_v39 }
  0xb8   :  { %v177_v39 = vmul.f32 %v173_v28, %v506_v2  ;;  %v196_v2 = vld [vmem:[#allocation5 + $0xa0] sm:$0xff] }
  0xb9   :  { %v120_v12 = vpop.permute.xlu1 %119  ;;  %v118_v13 = vpop.permute.xlu0 %117  ;;  %v115_v31 = vadd.f32 %v111_v52, %v89_v5  ;;  %v116_v32 = vadd.f32 %v112_v53, %v90_v6 }
  0xbd   :  { %v124_v14 = vpop.permute.xlu1 %123  ;;  %v122_v15 = vpop.permute.xlu0 %121 }
  0xbe   :  { %v127_v58 = vsel %vm125_vm2, %v120_v12, %v124_v14  ;;  %v129_v59 = vsel %vm125_vm2, %v124_v14, %v120_v12  ;;  %v126_v62 = vsel %vm125_vm2, %v118_v13, %v122_v15  ;;  %v128_v63 = vsel %vm125_vm2, %v122_v15, %v118_v13  ;;  %v157_v14 = vld [vmem:[#allocation5 + $0x60] sm:$0xff] }
  0xbf   :  { %v137_v22 = vmul.f32 %v133_v56, %v129_v59  ;;  %v138_v25 = vmul.f32 %v134_v57, %v127_v58  ;;  %v135_v26 = vmul.f32 %v131_v60, %v128_v63  ;;  %v136_v27 = vmul.f32 %v132_v61, %v126_v62  ;;  %v224_v60 = vld [vmem:[#allocation5 + $0xd0] sm:$0xff]  ;;  %v225_v61 = vld [vmem:[#allocation5 + $0xd8] sm:$0xff]  ;;  %v223_v63 = vld [vmem:[#allocation5 + $0xc8] sm:$0xff] }
  0xc1   :  { %v146_v17 = vpop.permute.xlu1 %145  ;;  %v544_v18 = vpop.permute.xlu0 %143  ;;  %v141_v40 = vadd.f32 %v137_v22, %v115_v31  ;;  %v142_v41 = vadd.f32 %v138_v25, %v116_v32  ;;  %v249_v22 = vld [vmem:[#allocation5 + $0xe8] sm:$0xff] }
  0xc5   :  { %v150_v20 = vpop.permute.xlu1 %149  ;;  %v148_v21 = vpop.permute.xlu0 %147 }
  0xc6   :  { %v153_v11 = vsel %vm151_vm3, %v146_v17, %v150_v20  ;;  %v155_v12 = vsel %vm151_vm3, %v150_v20, %v146_v17  ;;  %v152_v13 = vsel %vm151_vm3, %v544_v18, %v148_v21  ;;  %v154_v15 = vsel %vm151_vm3, %v148_v21, %v544_v18 }
  0xc7   :  { %v113_v17 = vadd.f32 %v109_v54, %v87_v3  ;;  %v114_v20 = vadd.f32 %v110_v55, %v88_v4  ;;  %v163_v33 = vmul.f32 %v159_v7, %v155_v12  ;;  %v164_v34 = vmul.f32 %v160_v10, %v153_v11  ;;  %v250_v11 = vld [vmem:[#allocation5 + $0xf0] sm:$0xff] }
  0xc8   :  { %v161_v35 = vmul.f32 %v157_v14, %v154_v15  ;;  %v162_v36 = vmul.f32 %v158_v16, %v152_v13  ;;  %v175_v18 = vmul.f32 %v171_v30, %v500_v0  ;;  %v174_v21 = vmul.f32 %v170_v29, %v502_v1  ;;  %v197_v1 = vld [vmem:[#allocation5 + $0xa8] sm:$0xff]  ;;  %v251_v16 = vld [vmem:[#allocation5 + $0xf8] sm:$0xff]  ;;  %v248_v15 = vld [vmem:[#allocation5 + $0xe0] sm:$0xff] }
  0xc9   :  { %v550_v23 = vpop.permute.xlu1 %184  ;;  %v552_v24 = vpop.permute.xlu0 %182  ;;  %v139_v42 = vadd.f32 %v135_v26, %v113_v17  ;;  %v140_v43 = vadd.f32 %v136_v27, %v114_v20  ;;  %v167_v52 = vadd.f32 %v163_v33, %v141_v40  ;;  %v168_v53 = vadd.f32 %v164_v34, %v142_v41  ;;  %v277_v40 = vld [vmem:[#allocation5 + $0x118] sm:$0xff]  ;;  %v274_v41 = vld [vmem:[#allocation5 + $0x100] sm:$0xff] }
  0xcb   :  { %v165_v54 = vadd.f32 %v161_v35, %v139_v42  ;;  %v166_v55 = vadd.f32 %v162_v36, %v140_v43  ;;  %v180_v5 = vadd.f32 %v569_v51, %v167_v52  ;;  %v181_v6 = vadd.f32 %v177_v39, %v168_v53  ;;  %v275_v42 = vld [vmem:[#allocation5 + $0x108] sm:$0xff] }
  0xcd   :  { %v563_v46 = vpop.permute.xlu1 %188  ;;  %v565_v47 = vpop.permute.xlu0 %186  ;;  %v179_v7 = vadd.f32 %v175_v18, %v166_v55  ;;  %v178_v10 = vadd.f32 %v174_v21, %v165_v54  ;;  %v276_v21 = vld [vmem:[#allocation5 + $0x110] sm:$0xff] }
  0xce   :  { %v192_v48 = vsel %vm190_vm4, %v550_v23, %v563_v46  ;;  %v194_v0 = vsel %vm190_vm4, %v563_v46, %v550_v23  ;;  %v191_v49 = vsel %vm190_vm4, %v552_v24, %v565_v47  ;;  %v193_v50 = vsel %vm190_vm4, %v565_v47, %v552_v24  ;;  %v222_v47 = vld [vmem:[#allocation5 + $0xc0] sm:$0xff] }
  0xcf   :  { %v202_v23 = vmul.f32 %v198_v44, %v192_v48  ;;  %v203_v46 = vmul.f32 %v199_v45, %v194_v0  ;;  %v200_v58 = vmul.f32 %v196_v2, %v191_v49  ;;  %v201_v59 = vmul.f32 %v197_v1, %v193_v50 }
  0xd1   :  { %v211_v8 = vpop.permute.xlu1 %210  ;;  %v209_v9 = vpop.permute.xlu0 %208  ;;  %v206_v29 = vadd.f32 %v202_v23, %v180_v5  ;;  %v207_v30 = vadd.f32 %v203_v46, %v181_v6  ;;  %v204_v31 = vadd.f32 %v200_v58, %v178_v10  ;;  %v205_v32 = vadd.f32 %v201_v59, %v179_v7 }
  0xd5   :  { %v215_v37 = vpop.permute.xlu1 %214  ;;  %v213_v38 = vpop.permute.xlu0 %212 }
  0xd6   :  { %v218_v62 = vsel %vm216_vm5, %v211_v8, %v215_v37  ;;  %v220_v24 = vsel %vm216_vm5, %v215_v37, %v211_v8  ;;  %v217_v3 = vsel %vm216_vm5, %v209_v9, %v213_v38  ;;  %v219_v4 = vsel %vm216_vm5, %v213_v38, %v209_v9 }
  0xd7   :  { %v228_v25 = vmul.f32 %v224_v60, %v218_v62  ;;  %v229_v26 = vmul.f32 %v225_v61, %v220_v24  ;;  %v226_v27 = vmul.f32 %v222_v47, %v217_v3  ;;  %v227_v28 = vmul.f32 %v223_v63, %v219_v4 }
  0xd9   :  { %v237_v56 = vpop.permute.xlu1 %236  ;;  %v235_v57 = vpop.permute.xlu0 %234  ;;  %v232_v37 = vadd.f32 %v228_v25, %v206_v29  ;;  %v233_v38 = vadd.f32 %v229_v26, %v207_v30  ;;  %v230_v39 = vadd.f32 %v226_v27, %v204_v31  ;;  %v231_v18 = vadd.f32 %v227_v28, %v205_v32 }
  0xdd   :  { %v241_v12 = vpop.permute.xlu1 %240  ;;  %v239_v14 = vpop.permute.xlu0 %238 }
  0xde   :  { %v244_v8 = vsel %vm242_vm6, %v237_v56, %v241_v12  ;;  %v246_v13 = vsel %vm242_vm6, %v241_v12, %v237_v56  ;;  %v243_v9 = vsel %vm242_vm6, %v235_v57, %v239_v14  ;;  %v245_v51 = vsel %vm242_vm6, %v239_v14, %v235_v57 }
  0xdf   :  { %v254_v17 = vmul.f32 %v250_v11, %v244_v8  ;;  %v255_v20 = vmul.f32 %v251_v16, %v246_v13  ;;  %v252_v33 = vmul.f32 %v248_v15, %v243_v9  ;;  %v253_v34 = vmul.f32 %v249_v22, %v245_v51 }
  0xe1   :  { %v263_v35 = vpop.permute.xlu1 %262  ;;  %v261_v36 = vpop.permute.xlu0 %260  ;;  %v258_v43 = vadd.f32 %v254_v17, %v232_v37  ;;  %v259_v44 = vadd.f32 %v255_v20, %v233_v38  ;;  %v256_v45 = vadd.f32 %v252_v33, %v230_v39  ;;  %v257_v48 = vadd.f32 %v253_v34, %v231_v18 }
  0xe5   :  { %v267_v0 = vpop.permute.xlu1 %266  ;;  %v265_v2 = vpop.permute.xlu0 %264 }
  0xe6   :  { %v270_v1 = vsel %vm268_vm7, %v263_v35, %v267_v0  ;;  %v272_v49 = vsel %vm268_vm7, %v267_v0, %v263_v35  ;;  %v269_v50 = vsel %vm268_vm7, %v261_v36, %v265_v2  ;;  %v271_v52 = vsel %vm268_vm7, %v265_v2, %v261_v36 }
  0xe7   :  { %v280_v53 = vmul.f32 %v276_v21, %v270_v1  ;;  %v281_v54 = vmul.f32 %v277_v40, %v272_v49  ;;  %v278_v55 = vmul.f32 %v274_v41, %v269_v50  ;;  %v279_v56 = vmul.f32 %v275_v42, %v271_v52 }
  0xe9   :  { %v284_v57 = vadd.f32 %v280_v53, %v258_v43  ;;  %v285_v23 = vadd.f32 %v281_v54, %v259_v44  ;;  %v282_v46 = vadd.f32 %v278_v55, %v256_v45  ;;  %v283_v58 = vadd.f32 %v279_v56, %v257_v48 }
  0xeb   :  { %288 = vst [vmem:[#allocation8 + $0x10] sm:$0xff] %v284_v57  ;;  %289 = vst [vmem:[#allocation8 + $0x18] sm:$0xff] %v285_v23 }
  0xec   :  { %286 = vst [vmem:[#allocation8] sm:$0xff] %v282_v46  ;;  %287 = vst [vmem:[#allocation8 + $0x8] sm:$0xff] %v283_v58 }
  0xed   :  { %398 = shalt.err (!%p395_p0)
}
  0xee   :  { %s399_s7 = scalar_lea.hbm %s655_s3, 512 }
  0xef   :  { %p400_p1 = scmp.ne.s32.totalorder %s655_s3, %s399_s7  ;;  %p403_p2 = scmp.lt.u32.totalorder %s399_s7, %s655_s3 }
  0xf1   :  { %p405_p3 = pnand %p403_p2, %p400_p1 }
  0xf3   :  { %408 = shalt.err (!%p405_p3)
}
  0xf4   :  { %301 = dma.vmem_to_hbm [thread:$0]  %s296_s30, 512, %s655_s3, [#allocation4], %s417_s24, %s417_s24, %s418_s25  }
  0xf5   :  { %413 = dma.done.wait [#allocation4], 512  }
  0xf6   :  { %414 = vsyncadd [#allocation4], 4294966784 }
  0xf7   :  { %305 = vsyncpa [#allocation3], 1 }
  0xf8   :  { %306 = vsyncpa [#allocation6], 1 }
  0xf9   :  { %307 = vsyncpa [#allocation4], 1 }

</bundles_post_ra>
